<compile_context>
chip_gen: v6e
topology: v6e:2x2x1
jax: 0.10.0
libtpu: 0.0.40
codegen_flags: <defaults>
</compile_context>

<pallas_src>
import jax
import jax.numpy as jnp
from jax.experimental import pallas as pl
from jax.experimental.pallas import tpu as pltpu

VOCAB_SIZE = 1026
EMBED_DIM = 32
LO = 128                                   # one-hot depth after hi/lo decomposition
LO_BITS = 7                                # LO == 1 << LO_BITS
NUM_HI = (VOCAB_SIZE + LO - 1) // LO       # 9 hi-blocks
VOCAB_PAD = NUM_HI * LO                    # 1152 (zero-padded rows are never selected)
EPS = 1e-12                                # torch F.normalize default eps
MAX_BLOCK_N = 2048                         # per-tile intermediates ~3 MiB -> fits v5e/v6e/v7x
MIN_PALLAS_N = 256                         # below this, XLA gather beats kernel launch/pad cost


def _species_embed_kernel(ids_ref, table_ref, out_ref):
    # ids_ref:   (1, BN)                 int32  VMEM
    # table_ref: (NUM_HI*EMBED_DIM, LO)  f32    VMEM (grid-invariant: constant index_map)
    # out_ref:   (EMBED_DIM, BN)         f32    VMEM (lane-dense output tile)
    bn = ids_ref.shape[1]

    ids = jnp.clip(ids_ref[...], 0, VOCAB_SIZE - 1)          # mirrors torch.clamp
    lo = jnp.bitwise_and(ids, LO - 1)                        # ids % 128   (ids >= 0 after clamp)
    hi = jnp.right_shift(ids, LO_BITS)                       # ids // 128, in [0, NUM_HI)

    # 128-deep transposed one-hot of the low bits (was 1152-deep before):
    #   onehot_lo[l, j] = (lo_j == l)
    lo_iota = jax.lax.broadcasted_iota(jnp.int32, (LO, bn), 0)
    onehot_lo = (lo == lo_iota).astype(jnp.float32)          # (LO, BN)

    # Single MXU matmul against the hi-stacked table:
    #   partial[h*EMBED_DIM + e, j] = table[h*LO + lo_j, e]
    partial = jnp.dot(table_ref[...], onehot_lo,
                      preferred_element_type=jnp.float32)    # (NUM_HI*EMBED_DIM, BN)

    # Select the hi-block each column belongs to: 8 masked selects on (32, BN)
    # tiles replace the other 8/9ths of the old one-hot build.
    emb_t = partial[0:EMBED_DIM, :]                          # hi == 0 block
    for h in range(1, NUM_HI):
        blk = partial[h * EMBED_DIM:(h + 1) * EMBED_DIM, :]  # static sublane-aligned slice
        emb_t = jnp.where(hi == h, blk, emb_t)               # (1,BN) mask bcast over sublanes

    # L2 normalize along the embedding (sublane) axis; rsqrt runs on the EUP.
    # emb * rsqrt(max(sum(emb^2), eps^2)) == emb / max(||emb||, eps)  (torch semantics).
    sq = jnp.sum(emb_t * emb_t, axis=0, keepdims=True)       # (1, BN)
    inv = jax.lax.rsqrt(jnp.maximum(sq, EPS * EPS))
    out_ref[...] = emb_t * inv


def make_params(table):
    """Build forward-pass parameters ONCE at init.

    Returns (table_f32, table_stacked):
      table_f32     : (VOCAB_SIZE, EMBED_DIM) f32 — used by the tiny-N XLA fallback.
      table_stacked : (NUM_HI*EMBED_DIM, LO)  f32 — hi-stacked layout consumed by the
                      kernel: table_stacked[h*EMBED_DIM + e, l] == table[h*LO + l, e].
    """
    table = table.astype(jnp.float32)
    padded = jnp.zeros((VOCAB_PAD, EMBED_DIM), jnp.float32).at[:VOCAB_SIZE].set(table)
    stacked = (padded.reshape(NUM_HI, LO, EMBED_DIM)
                     .transpose(0, 2, 1)
                     .reshape(NUM_HI * EMBED_DIM, LO))
    return table, stacked


def _pick_block_n(n, max_block_n=MAX_BLOCK_N):
    """Lane-aligned tile width: as large as allowed (amortize ~0.35 us/step) while
    keeping >= 2 grid steps whenever possible so the "parallel" axis feeds both
    v7x TensorCores (harmless single extra step on 1-TC v5e/v6e)."""
    max_block_n = max(128, (max_block_n // 128) * 128)
    n128 = ((n + 127) // 128) * 128
    if n128 <= 128:
        return 128
    half = ((-(-n128 // 2)) + 127) // 128 * 128              # cdiv(n, 2) rounded up to 128
    return min(max_block_n, half)


def species_embedding_forward(species_ids, params, *, max_block_n=MAX_BLOCK_N,
                              min_pallas_n=MIN_PALLAS_N, return_transposed=False):
    """species_ids: int array of any shape.  params: from make_params(table).
    Returns normalized embeddings, shape species_ids.shape + (EMBED_DIM,)
    (or lane-dense (EMBED_DIM, N) if return_transposed=True)."""
    table, table_stacked = params
    orig_shape = species_ids.shape
    ids_flat = species_ids.reshape(-1).astype(jnp.int32)
    n = ids_flat.shape[0]

    if n < max(min_pallas_n, 1):
        # Tiny-call fallback: plain-XLA gather + normalize (kernel launch, padding to
        # 128 and the wrapper transpose are pure overhead at this size).
        idc = jnp.clip(ids_flat, 0, VOCAB_SIZE - 1)
        emb = table[idc]
        denom = jnp.maximum(jnp.linalg.norm(emb, axis=-1, keepdims=True), EPS)
        out = emb / denom
        if return_transposed:
            return out.T
        return out.reshape(*orig_shape, EMBED_DIM)

    block_n = _pick_block_n(n, max_block_n)
    n_pad = ((n + block_n - 1) // block_n) * block_n
    # padded tail ids are 0; table row 0 is all-zero so padded outputs are 0.
    ids_row = jnp.pad(ids_flat, (0, n_pad - n)).reshape(1, n_pad)

    out_t = pl.pallas_call(
        _species_embed_kernel,
        out_shape=jax.ShapeDtypeStruct((EMBED_DIM, n_pad), jnp.float32),
        grid_spec=pltpu.PrefetchScalarGridSpec(
            num_scalar_prefetch=0,
            grid=(n_pad // block_n,),
            in_specs=[
                pl.BlockSpec((1, block_n), lambda i: (0, i)),
                # constant index_map keeps the 144 KiB stacked table resident across steps
                pl.BlockSpec((NUM_HI * EMBED_DIM, LO), lambda i: (0, 0)),
            ],
            out_specs=pl.BlockSpec((EMBED_DIM, block_n), lambda i: (0, i)),
        ),
        compiler_params=pltpu.CompilerParams(
            dimension_semantics=("parallel",)),
    )(ids_row, table_stacked)

    if return_transposed:
        # lane-dense (EMBED_DIM, N); consumers can fold the transpose into their own
        # dot_general and skip an extra HBM transpose pass on large N.
        return out_t[:, :n]
    out = out_t[:, :n].T                                     # (n, EMBED_DIM)
    return out.reshape(*orig_shape, EMBED_DIM)


def init_embedding_table(key):
    """Deterministic synthetic init mirroring _init_with_base_stats:
    xavier_uniform(gain=0.1) everywhere, first 6 dims of rows 1..151 overwritten
    with synthetic normalized base stats, row 0 zeroed.  (No CSV / file I/O.)"""
    fan_in, fan_out = VOCAB_SIZE, EMBED_DIM
    limit = 0.1 * jnp.sqrt(6.0 / (fan_in + fan_out))
    table = jax.random.uniform(key, (VOCAB_SIZE, EMBED_DIM), jnp.float32,
                               minval=-limit, maxval=limit)
    n_mons = 151
    rows = jnp.arange(1, n_mons + 1, dtype=jnp.float32)[:, None]        # (151, 1)
    cols = jnp.arange(6, dtype=jnp.float32)[None, :]                    # (1, 6)
    stats = ((rows * 37.0 + cols * 13.0) % 256.0) / 255.0               # like stat / 255.0
    table = table.at[1:n_mons + 1, :6].set(stats)
    table = table.at[0].set(0.0)
    return table


if __name__ == "__main__":
    key = jax.random.PRNGKey(0)
    k_table, k_ids1, k_ids2 = jax.random.split(key, 3)

    table = init_embedding_table(k_table)
    params = make_params(table)                 # built once, reused per forward

    def reference(ids):
        idc = jnp.clip(ids.astype(jnp.int32), 0, VOCAB_SIZE - 1)
        emb = table[idc]
        denom = jnp.maximum(jnp.linalg.norm(emb, axis=-1, keepdims=True), EPS)
        return emb / denom

    # 1) small (batch=2, seq=8) input forced through the Pallas kernel path
    #    (some ids out-of-range to exercise the clamp).
    ids_small = jax.random.randint(k_ids1, (2, 8), minval=-5, maxval=VOCAB_SIZE + 50)
    out_small = jax.block_until_ready(
        species_embedding_forward(ids_small, params, min_pallas_n=0))
    assert out_small.shape == (2, 8, EMBED_DIM)
    assert jnp.max(jnp.abs(out_small - reference(ids_small))) < 1e-5

    # 2) larger call exercising the multi-step grid + default block_n heuristics.
    ids_big = jax.random.randint(k_ids2, (4, 300), minval=-3, maxval=VOCAB_SIZE + 20)
    out_big = jax.block_until_ready(species_embedding_forward(ids_big, params))
    assert out_big.shape == (4, 300, EMBED_DIM)
    assert jnp.max(jnp.abs(out_big - reference(ids_big))) < 1e-5

    # 3) tiny-N plain-XLA fallback path (default thresholds).
    out_fb = jax.block_until_ready(species_embedding_forward(ids_small, params))
    assert jnp.max(jnp.abs(out_fb - reference(ids_small))) < 1e-6

    print("KERNEL_OK")
</pallas_src>

<mosaic_0001>
module attributes {stable_mosaic.version = 11 : i64} {
  func.func @_species_embed_kernel(%arg0: i32, %arg1: memref<1x128xi32, #tpu.memory_space<vmem>>, %arg2: memref<288x128xf32, #tpu.memory_space<vmem>>, %arg3: memref<32x128xf32, #tpu.memory_space<vmem>>) attributes {dimension_semantics = [#tpu.dimension_semantics<parallel>], iteration_bounds = array<i64: 1>, scalar_prefetch = 0 : i64, scratch_operands = 0 : i64, tpu.core_type = #tpu.core_type<tc>, window_params = [{transform_indices = @transform_0, window_bounds = array<i64: 1, 128>}, {pipeline_mode = #tpu.pipeline_mode<synchronous>, transform_indices = @transform_1, window_bounds = array<i64: 288, 128>}, {transform_indices = @transform_2, window_bounds = array<i64: 32, 128>}]} {
    %c0 = arith.constant 0 : index
    %c0_0 = arith.constant 0 : index
    %0 = vector.load %arg1[%c0, %c0_0] : memref<1x128xi32, #tpu.memory_space<vmem>>, vector<1x128xi32>
    %c0_i32 = arith.constant 0 : i32
    %c1025_i32 = arith.constant 1025 : i32
    %1 = vector.broadcast %c0_i32 : i32 to vector<1x128xi32>
    %2 = arith.maxsi %1, %0 : vector<1x128xi32>
    %3 = vector.broadcast %c1025_i32 : i32 to vector<1x128xi32>
    %4 = arith.minsi %3, %2 : vector<1x128xi32>
    %c127_i32 = arith.constant 127 : i32
    %5 = vector.broadcast %c127_i32 : i32 to vector<1x128xi32>
    %6 = arith.andi %4, %5 : vector<1x128xi32>
    %c7_i32 = arith.constant 7 : i32
    %7 = vector.broadcast %c7_i32 : i32 to vector<1x128xi32>
    %8 = arith.shrsi %4, %7 : vector<1x128xi32>
    %9 = tpu.iota {dimensions = array<i32: 0>} : vector<128x128xi32>
    %10 = vector.broadcast %6 : vector<1x128xi32> to vector<128x128xi32>
    %11 = arith.cmpi eq, %10, %9 : vector<128x128xi32>
    %12 = arith.extui %11 : vector<128x128xi1> to vector<128x128xi32>
    %13 = arith.sitofp %12 : vector<128x128xi32> to vector<128x128xf32>
    %c0_1 = arith.constant 0 : index
    %c0_2 = arith.constant 0 : index
    %14 = vector.load %arg2[%c0_1, %c0_2] : memref<288x128xf32, #tpu.memory_space<vmem>>, vector<288x128xf32>
    %cst = arith.constant dense<0.000000e+00> : vector<288x128xf32>
    %15 = tpu.matmul %14, %13, %cst {dimension_numbers = #tpu.dot_dimension_numbers<[1], [0], [0], [1], [0, 0, 1, 1], [], []>} : vector<288x128xf32>, vector<128x128xf32>, vector<288x128xf32> -> vector<288x128xf32>
    %16 = vector.extract_strided_slice %15 {offsets = [0, 0], sizes = [32, 128], strides = [1, 1]} : vector<288x128xf32> to vector<32x128xf32>
    %17 = vector.extract_strided_slice %15 {offsets = [32, 0], sizes = [32, 128], strides = [1, 1]} : vector<288x128xf32> to vector<32x128xf32>
    %c1_i32 = arith.constant 1 : i32
    %18 = vector.broadcast %c1_i32 : i32 to vector<1x128xi32>
    %19 = arith.cmpi eq, %8, %18 : vector<1x128xi32>
    %20 = vector.shape_cast %19 : vector<1x128xi1> to vector<1x128xi1>
    %21 = vector.broadcast %20 : vector<1x128xi1> to vector<32x128xi1>
    %22 = arith.select %21, %17, %16 : vector<32x128xi1>, vector<32x128xf32>
    %23 = vector.extract_strided_slice %15 {offsets = [64, 0], sizes = [32, 128], strides = [1, 1]} : vector<288x128xf32> to vector<32x128xf32>
    %c2_i32 = arith.constant 2 : i32
    %24 = vector.broadcast %c2_i32 : i32 to vector<1x128xi32>
    %25 = arith.cmpi eq, %8, %24 : vector<1x128xi32>
    %26 = vector.shape_cast %25 : vector<1x128xi1> to vector<1x128xi1>
    %27 = vector.broadcast %26 : vector<1x128xi1> to vector<32x128xi1>
    %28 = arith.select %27, %23, %22 : vector<32x128xi1>, vector<32x128xf32>
    %29 = vector.extract_strided_slice %15 {offsets = [96, 0], sizes = [32, 128], strides = [1, 1]} : vector<288x128xf32> to vector<32x128xf32>
    %c3_i32 = arith.constant 3 : i32
    %30 = vector.broadcast %c3_i32 : i32 to vector<1x128xi32>
    %31 = arith.cmpi eq, %8, %30 : vector<1x128xi32>
    %32 = vector.shape_cast %31 : vector<1x128xi1> to vector<1x128xi1>
    %33 = vector.broadcast %32 : vector<1x128xi1> to vector<32x128xi1>
    %34 = arith.select %33, %29, %28 : vector<32x128xi1>, vector<32x128xf32>
    %35 = vector.extract_strided_slice %15 {offsets = [128, 0], sizes = [32, 128], strides = [1, 1]} : vector<288x128xf32> to vector<32x128xf32>
    %c4_i32 = arith.constant 4 : i32
    %36 = vector.broadcast %c4_i32 : i32 to vector<1x128xi32>
    %37 = arith.cmpi eq, %8, %36 : vector<1x128xi32>
    %38 = vector.shape_cast %37 : vector<1x128xi1> to vector<1x128xi1>
    %39 = vector.broadcast %38 : vector<1x128xi1> to vector<32x128xi1>
    %40 = arith.select %39, %35, %34 : vector<32x128xi1>, vector<32x128xf32>
    %41 = vector.extract_strided_slice %15 {offsets = [160, 0], sizes = [32, 128], strides = [1, 1]} : vector<288x128xf32> to vector<32x128xf32>
    %c5_i32 = arith.constant 5 : i32
    %42 = vector.broadcast %c5_i32 : i32 to vector<1x128xi32>
    %43 = arith.cmpi eq, %8, %42 : vector<1x128xi32>
    %44 = vector.shape_cast %43 : vector<1x128xi1> to vector<1x128xi1>
    %45 = vector.broadcast %44 : vector<1x128xi1> to vector<32x128xi1>
    %46 = arith.select %45, %41, %40 : vector<32x128xi1>, vector<32x128xf32>
    %47 = vector.extract_strided_slice %15 {offsets = [192, 0], sizes = [32, 128], strides = [1, 1]} : vector<288x128xf32> to vector<32x128xf32>
    %c6_i32 = arith.constant 6 : i32
    %48 = vector.broadcast %c6_i32 : i32 to vector<1x128xi32>
    %49 = arith.cmpi eq, %8, %48 : vector<1x128xi32>
    %50 = vector.shape_cast %49 : vector<1x128xi1> to vector<1x128xi1>
    %51 = vector.broadcast %50 : vector<1x128xi1> to vector<32x128xi1>
    %52 = arith.select %51, %47, %46 : vector<32x128xi1>, vector<32x128xf32>
    %53 = vector.extract_strided_slice %15 {offsets = [224, 0], sizes = [32, 128], strides = [1, 1]} : vector<288x128xf32> to vector<32x128xf32>
    %c7_i32_3 = arith.constant 7 : i32
    %54 = vector.broadcast %c7_i32_3 : i32 to vector<1x128xi32>
    %55 = arith.cmpi eq, %8, %54 : vector<1x128xi32>
    %56 = vector.shape_cast %55 : vector<1x128xi1> to vector<1x128xi1>
    %57 = vector.broadcast %56 : vector<1x128xi1> to vector<32x128xi1>
    %58 = arith.select %57, %53, %52 : vector<32x128xi1>, vector<32x128xf32>
    %59 = vector.extract_strided_slice %15 {offsets = [256, 0], sizes = [32, 128], strides = [1, 1]} : vector<288x128xf32> to vector<32x128xf32>
    %c8_i32 = arith.constant 8 : i32
    %60 = vector.broadcast %c8_i32 : i32 to vector<1x128xi32>
    %61 = arith.cmpi eq, %8, %60 : vector<1x128xi32>
    %62 = vector.shape_cast %61 : vector<1x128xi1> to vector<1x128xi1>
    %63 = vector.broadcast %62 : vector<1x128xi1> to vector<32x128xi1>
    %64 = arith.select %63, %59, %58 : vector<32x128xi1>, vector<32x128xf32>
    %65 = arith.mulf %64, %64 : vector<32x128xf32>
    %cst_4 = arith.constant dense<0.000000e+00> : vector<128xf32>
    %66 = vector.multi_reduction <add>, %65, %cst_4 [0] : vector<32x128xf32> to vector<128xf32>
    %67 = vector.shape_cast %66 : vector<128xf32> to vector<1x128xf32>
    %cst_5 = arith.constant 1.000000e-24 : f32
    %68 = vector.broadcast %cst_5 : f32 to vector<1x128xf32>
    %69 = arith.maximumf %67, %68 : vector<1x128xf32>
    %70 = math.rsqrt %69 : vector<1x128xf32>
    %71 = vector.broadcast %70 : vector<1x128xf32> to vector<32x128xf32>
    %72 = arith.mulf %64, %71 : vector<32x128xf32>
    %c0_6 = arith.constant 0 : index
    %c0_7 = arith.constant 0 : index
    %73 = vector.load %arg3[%c0_6, %c0_7] : memref<32x128xf32, #tpu.memory_space<vmem>>, vector<32x128xf32>
    tpu.vector_store %arg3[%c0_6, %c0_7], %72 {strides = array<i32>} : memref<32x128xf32, #tpu.memory_space<vmem>>, vector<32x128xf32>,
    return
  }
  func.func @transform_0(%arg0: i32) -> (i32, i32) {
    %c0_i32 = arith.constant 0 : i32
    %c0_i32_0 = arith.constant 0 : i32
    return %c0_i32, %arg0 : i32, i32
  }
  func.func @transform_1(%arg0: i32) -> (i32, i32) {
    %c0_i32 = arith.constant 0 : i32
    %c0_i32_0 = arith.constant 0 : i32
    %c0_i32_1 = arith.constant 0 : i32
    return %c0_i32, %c0_i32_0 : i32, i32
  }
  func.func @transform_2(%arg0: i32) -> (i32, i32) {
    %c0_i32 = arith.constant 0 : i32
    %c0_i32_0 = arith.constant 0 : i32
    return %c0_i32, %arg0 : i32, i32
  }
}

</mosaic_0001>

<bundles_post_ra>
// kernel: tpu_custom_call.1
= control target key start
LH: loop header
LB: loop body
LE: loop exit
PB: predicated region body
PF: predicated region fallthrough
CT: control target
= control target key end

     0   :  { %7 = vsyncpa [#allocation3], 0  ;;  %s1089_s0 = inlined_call_operand.hbm [shape: s32[1,128], index: 0, kind: input, shape index: {}]   ;;  %s1090_s1 = inlined_call_operand.hbm [shape: f32[288,128], index: 1, kind: input, shape index: {}]   ;;  %s1091_s2 = inlined_call_operand.hbm [shape: f32[32,128], index: 2, kind: output, shape index: {}]  }
   0x1   :  { %8 = vsyncpa [#allocation6], 0 }
   0x2   :  { %9 = vsyncpa [#allocation4], 0  ;;  %s801_s9 = smov [#allocation2]   ;;  %s802_s11 = smov [#allocation5]  }
   0x3   :  { %s16_s10 = sshll.u32 %s801_s9, 4  ;;  %s25_s12 = sshll.u32 %s802_s11, 4  ;;  %s17_s10 = int_to_ptr.vmem [resolvable:$true] %s16_s10  ;;  %s26_s12 = int_to_ptr.vmem [resolvable:$true] %s25_s12 }
   0x4   :  { %s743_s13 = scalar_lea.vmem %s17_s10, 16  ;;  %s747_s14 = scalar_lea.vmem %s17_s10, 32 }
   0x5   :  { %p744_p0 = scmp.ne.s32.totalorder %s17_s10, %s743_s13  ;;  %p748_p1 = scmp.lt.s32.totalorder %s17_s10, %s17_s10 }
   0x6   :  { %p749_p2 = scmp.lt.s32.totalorder %s747_s14, %s743_s13 }
   0x8   :  { %p750_p3 = por %p749_p2, %p748_p1 }
   0xa   :  { %p751_p4 = pnand %p750_p3, %p744_p0 }
   0xc   :  { %754 = shalt.err (!%p751_p4)
}
   0xd   :  { %19 = dma.hbm_to_vmem [thread:$0]  %s1089_s0, 16, %s17_s10, [#allocation3]  }
   0xe   :  { %s763_s17 = scalar_lea.vmem %s26_s12, 4608  ;;  %p768_p6 = scmp.lt.s32.totalorder %s26_s12, %s26_s12 }
   0xf   :  { %p764_p5 = scmp.ne.s32.totalorder %s26_s12, %s763_s17  ;;  %p769_p7 = scmp.lt.s32.totalorder %s763_s17, %s763_s17 }
  0x11   :  { %p770_p8 = por %p769_p7, %p768_p6 }
  0x13   :  { %p771_p9 = pnand %p770_p8, %p764_p5 }
  0x15   :  { %774 = shalt.err (!%p771_p9)
}
  0x16   :  { %s803_s18 = smov 128   ;;  %s804_s19 = smov 8  }
  0x17   :  { %31 = dma.hbm_to_vmem [thread:$0]  %s1090_s1, 4608, %s26_s12, [#allocation6], %s803_s18, %s803_s18, %s804_s19  }
  0x18   :  { %795 = dma.done.wait [#allocation3], 16  }
  0x19   :  { %796 = vsyncadd [#allocation3], 4294967280 }
  0x1a   :  { %797 = dma.done.wait [#allocation6], 4608  }
  0x1b   :  { %798 = vsyncadd [#allocation6], 4294962688  ;;  %v45_v0 = vlaneseq  ;;  %v38_v2 = vld [vmem:[#allocation2] sm:$0x1]  ;;  %v114_v3 = vld [vmem:[#allocation5] sm:$0xff]  ;;  %v805_v14 = vmov 1.0  }
  0x1c   :  { %vm39_vm0 = vcmp.gt.s32.totalorder %v38_v2, 0  ;;  %v132_v4 = vld [vmem:[#allocation5 + $0x90] sm:$0xff]  ;;  %640 = vmatprep.mubr.f32.mxu0 %v114_v3  ;;  %v115_v26 = vld [vmem:[#allocation5 + $0x8] sm:$0xff]  ;;  %v133_v27 = vld [vmem:[#allocation5 + $0x98] sm:$0xff]  ;;  %s807_s0 = smov [#allocation7]  }
  0x1d   :  { %v832_v1 = vshrl.u32 %v45_v0, 7  ;;  %v40_v5 = vsel %vm39_vm0, %v38_v2, 0  ;;  %667 = vmatprep.mubr.f32.mxu1 %v132_v4  ;;  %v116_v28 = vld [vmem:[#allocation5 + $0x10] sm:$0xff]  ;;  %v134_v29 = vld [vmem:[#allocation5 + $0xa0] sm:$0xff]  ;;  %v117_v30 = vld [vmem:[#allocation5 + $0x18] sm:$0xff]  ;;  %s511_s1 = sshll.u32 %s807_s0, 4  ;;  %s512_s1 = int_to_ptr.vmem [resolvable:$true] %s511_s1 }
  0x1e   :  { %vm41_vm1 = vcmp.lt.s32.totalorder %v40_v5, 1025  ;;  %v135_v31 = vld [vmem:[#allocation5 + $0xa8] sm:$0xff]  ;;  %v118_v32 = vld [vmem:[#allocation5 + $0x20] sm:$0xff]  ;;  %v136_v33 = vld [vmem:[#allocation5 + $0xb0] sm:$0xff]  ;;  %s775_s22 = scalar_lea.vmem %s512_s1, 512  ;;  %p780_p11 = scmp.lt.s32.totalorder %s512_s1, %s512_s1 }
  0x1f   :  { %v835_v6 = vsub.s32 0, %v832_v1  ;;  %v837_v7 = vsel %vm41_vm1, %v40_v5, 1025  ;;  %v61_v9 = vadd.s32 120, %v832_v1  ;;  %v60_v10 = vadd.s32 112, %v832_v1  ;;  %v119_v34 = vld [vmem:[#allocation5 + $0x28] sm:$0xff]  ;;  %v137_v35 = vld [vmem:[#allocation5 + $0xb8] sm:$0xff]  ;;  %p776_p10 = scmp.ne.s32.totalorder %s512_s1, %s775_s22  ;;  %p781_p12 = scmp.lt.s32.totalorder %s775_s22, %s775_s22 }
  0x20   :  { %v43_v8 = vand.u32 127, %v837_v7  ;;  %v59_v12 = vadd.s32 104, %v832_v1  ;;  %v58_v13 = vadd.s32 96, %v832_v1  ;;  %v57_v15 = vadd.s32 88, %v832_v1  ;;  %v120_v36 = vld [vmem:[#allocation5 + $0x30] sm:$0xff]  ;;  %v138_v37 = vld [vmem:[#allocation5 + $0xc0] sm:$0xff] }
  0x21   :  { %v56_v16 = vadd.s32 80, %v832_v1  ;;  %v55_v17 = vadd.s32 72, %v832_v1  ;;  %v54_v18 = vadd.s32 64, %v832_v1  ;;  %v53_v19 = vadd.s32 56, %v832_v1  ;;  %v121_v38 = vld [vmem:[#allocation5 + $0x38] sm:$0xff]  ;;  %v139_v39 = vld [vmem:[#allocation5 + $0xc8] sm:$0xff]  ;;  %p782_p13 = por %p781_p12, %p780_p11 }
  0x22   :  { %v843_v11 = vrot.slane %v43_v8, %v835_v6  ;;  %v52_v20 = vadd.s32 48, %v832_v1  ;;  %v51_v21 = vadd.s32 40, %v832_v1  ;;  %v50_v22 = vadd.s32 32, %v832_v1  ;;  %v122_v40 = vld [vmem:[#allocation5 + $0x40] sm:$0xff]  ;;  %v140_v41 = vld [vmem:[#allocation5 + $0xd0] sm:$0xff]  ;;  %v123_v42 = vld [vmem:[#allocation5 + $0x48] sm:$0xff] }
  0x23   :  { %v49_v23 = vadd.s32 24, %v832_v1  ;;  %v48_v24 = vadd.s32 16, %v832_v1  ;;  %v47_v25 = vadd.s32 8, %v832_v1  ;;  %v141_v43 = vld [vmem:[#allocation5 + $0xd8] sm:$0xff]  ;;  %v124_v44 = vld [vmem:[#allocation5 + $0x50] sm:$0xff]  ;;  %v142_v45 = vld [vmem:[#allocation5 + $0xe0] sm:$0xff]  ;;  %p783_p0 = pnand %p782_p13, %p776_p10 }
  0x24   :  { %vm81_vm2 = vcmp.eq.s32.totalorder %v843_v11, %v61_v9  ;;  %vm80_vm3 = vcmp.eq.s32.totalorder %v843_v11, %v60_v10  ;;  %vm79_vm4 = vcmp.eq.s32.totalorder %v843_v11, %v59_v12  ;;  %vm78_vm5 = vcmp.eq.s32.totalorder %v843_v11, %v58_v13  ;;  %v125_v46 = vld [vmem:[#allocation5 + $0x58] sm:$0xff]  ;;  %v143_v47 = vld [vmem:[#allocation5 + $0xe8] sm:$0xff]  ;;  %v126_v48 = vld [vmem:[#allocation5 + $0x60] sm:$0xff] }
  0x25   :  { %608 = vmatprep.subr.msk.mxu0 %vm81_vm2, %v805_v14  ;;  %694 = vmatprep.subr.msk.mxu1 %vm81_vm2, %v805_v14  ;;  %vm77_vm6 = vcmp.eq.s32.totalorder %v843_v11, %v57_v15  ;;  %vm76_vm7 = vcmp.eq.s32.totalorder %v843_v11, %v56_v16  ;;  %vm75_vm8 = vcmp.eq.s32.totalorder %v843_v11, %v55_v17  ;;  %v144_v49 = vld [vmem:[#allocation5 + $0xf0] sm:$0xff]  ;;  %v127_v50 = vld [vmem:[#allocation5 + $0x68] sm:$0xff]  ;;  %v145_v51 = vld [vmem:[#allocation5 + $0xf8] sm:$0xff]  ;;  %v44_v10 = vshra.s32 %v837_v7, 7 }
  0x26   :  { %609 = vmatpush3.msk.msra.mxu0 %vm81_vm2, %v805_v14  ;;  %710 = vmatpush3.msk.msra.mxu1 %vm81_vm2, %v805_v14  ;;  %vm74_vm9 = vcmp.eq.s32.totalorder %v843_v11, %v54_v18  ;;  %vm73_vm10 = vcmp.eq.s32.totalorder %v843_v11, %v53_v19  ;;  %vm72_vm11 = vcmp.eq.s32.totalorder %v843_v11, %v52_v20  ;;  %v128_v52 = vld [vmem:[#allocation5 + $0x70] sm:$0xff]  ;;  %v146_v53 = vld [vmem:[#allocation5 + $0x100] sm:$0xff]  ;;  %v129_v54 = vld [vmem:[#allocation5 + $0x78] sm:$0xff]  ;;  %v806_v19 = vmov 0  }
  0x27   :  { %610 = vmatprep.subr.msk.mxu0 %vm80_vm3, %v805_v14  ;;  %695 = vmatprep.subr.msk.mxu1 %vm80_vm3, %v805_v14  ;;  %vm71_vm12 = vcmp.eq.s32.totalorder %v843_v11, %v51_v21  ;;  %vm70_vm13 = vcmp.eq.s32.totalorder %v843_v11, %v50_v22  ;;  %vm69_vm14 = vcmp.eq.s32.totalorder %v843_v11, %v49_v23  ;;  %v147_v55 = vld [vmem:[#allocation5 + $0x108] sm:$0xff]  ;;  %v130_v56 = vld [vmem:[#allocation5 + $0x80] sm:$0xff]  ;;  %v148_v57 = vld [vmem:[#allocation5 + $0x110] sm:$0xff]  ;;  %vm395_vm2 = vcmp.eq.s32.totalorder %v44_v10, 1 }
  0x28   :  { %611 = vmatpush3.msk.msra.mxu0 %vm80_vm3, %v805_v14  ;;  %711 = vmatpush3.msk.msra.mxu1 %vm80_vm3, %v805_v14  ;;  %vm68_vm15 = vcmp.eq.s32.totalorder %v843_v11, %v48_v24  ;;  %vm67_vm0 = vcmp.eq.s32.totalorder %v843_v11, %v47_v25  ;;  %vm66_vm1 = vcmp.eq.s32.totalorder %v843_v11, %v832_v1  ;;  %v131_v58 = vld [vmem:[#allocation5 + $0x88] sm:$0xff]  ;;  %v149_v59 = vld [vmem:[#allocation5 + $0x118] sm:$0xff]  ;;  %vm406_vm3 = vcmp.eq.s32.totalorder %v44_v10, 2 }
  0x29   :  { %612 = vmatprep.subr.msk.mxu0 %vm79_vm4, %v805_v14  ;;  %696 = vmatprep.subr.msk.mxu1 %vm79_vm4, %v805_v14  ;;  %v396_v20 = vsel %vm395_vm2, 1, %v806_v19  ;;  %v407_v21 = vsel %vm406_vm3, 1, %v806_v19 }
  0x2a   :  { %613 = vmatpush3.msk.msra.mxu0 %vm79_vm4, %v805_v14  ;;  %712 = vmatpush3.msk.msra.mxu1 %vm79_vm4, %v805_v14  ;;  %vm428_vm4 = vcmp.eq.s32.totalorder %v44_v10, 4  ;;  %v400_v25 = vrot.slane %v396_v20, %v835_v6 }
  0x2b   :  { %614 = vmatprep.subr.msk.mxu0 %vm78_vm5, %v805_v14  ;;  %697 = vmatprep.subr.msk.mxu1 %vm78_vm5, %v805_v14  ;;  %v429_v23 = vsel %vm428_vm4, 1, %v806_v19 }
  0x2c   :  { %615 = vmatpush3.msk.msra.mxu0 %vm78_vm5, %v805_v14  ;;  %713 = vmatpush3.msk.msra.mxu1 %vm78_vm5, %v805_v14  ;;  %vm417_vm5 = vcmp.eq.s32.totalorder %v44_v10, 3 }
  0x2d   :  { %616 = vmatprep.subr.msk.mxu0 %vm77_vm6, %v805_v14  ;;  %698 = vmatprep.subr.msk.mxu1 %vm77_vm6, %v805_v14  ;;  %v418_v24 = vsel %vm417_vm5, 1, %v806_v19 }
  0x2e   :  { %617 = vmatpush3.msk.msra.mxu0 %vm77_vm6, %v805_v14  ;;  %714 = vmatpush3.msk.msra.mxu1 %vm77_vm6, %v805_v14  ;;  %vm439_vm6 = vcmp.eq.s32.totalorder %v44_v10, 5 }
  0x2f   :  { %618 = vmatprep.subr.msk.mxu0 %vm76_vm7, %v805_v14  ;;  %699 = vmatprep.subr.msk.mxu1 %vm76_vm7, %v805_v14 }
  0x30   :  { %619 = vmatpush3.msk.msra.mxu0 %vm76_vm7, %v805_v14  ;;  %715 = vmatpush3.msk.msra.mxu1 %vm76_vm7, %v805_v14  ;;  %vm450_vm7 = vcmp.eq.s32.totalorder %v44_v10, 6 }
  0x31   :  { %620 = vmatprep.subr.msk.mxu0 %vm75_vm8, %v805_v14  ;;  %700 = vmatprep.subr.msk.mxu1 %vm75_vm8, %v805_v14 }
  0x32   :  { %621 = vmatpush3.msk.msra.mxu0 %vm75_vm8, %v805_v14  ;;  %716 = vmatpush3.msk.msra.mxu1 %vm75_vm8, %v805_v14  ;;  %vm461_vm8 = vcmp.eq.s32.totalorder %v44_v10, 7 }
  0x33   :  { %622 = vmatprep.subr.msk.mxu0 %vm74_vm9, %v805_v14  ;;  %701 = vmatprep.subr.msk.mxu1 %vm74_vm9, %v805_v14 }
  0x34   :  { %623 = vmatpush3.msk.msra.mxu0 %vm74_vm9, %v805_v14  ;;  %717 = vmatpush3.msk.msra.mxu1 %vm74_vm9, %v805_v14  ;;  %vm472_vm9 = vcmp.eq.s32.totalorder %v44_v10, 8 }
  0x35   :  { %624 = vmatprep.subr.msk.mxu0 %vm73_vm10, %v805_v14  ;;  %702 = vmatprep.subr.msk.mxu1 %vm73_vm10, %v805_v14 }
  0x36   :  { %625 = vmatpush3.msk.msra.mxu0 %vm73_vm10, %v805_v14  ;;  %718 = vmatpush3.msk.msra.mxu1 %vm73_vm10, %v805_v14  ;;  %vm979_vm10 = vcmp.eq.s32.totalorder %v400_v25, 1 }
  0x37   :  { %626 = vmatprep.subr.msk.mxu0 %vm72_vm11, %v805_v14  ;;  %703 = vmatprep.subr.msk.mxu1 %vm72_vm11, %v805_v14 }
  0x38   :  { %627 = vmatpush3.msk.msra.mxu0 %vm72_vm11, %v805_v14  ;;  %719 = vmatpush3.msk.msra.mxu1 %vm72_vm11, %v805_v14 }
  0x39   :  { %628 = vmatprep.subr.msk.mxu0 %vm71_vm12, %v805_v14  ;;  %704 = vmatprep.subr.msk.mxu1 %vm71_vm12, %v805_v14 }
  0x3a   :  { %629 = vmatpush3.msk.msra.mxu0 %vm71_vm12, %v805_v14  ;;  %720 = vmatpush3.msk.msra.mxu1 %vm71_vm12, %v805_v14 }
  0x3b   :  { %630 = vmatprep.subr.msk.mxu0 %vm70_vm13, %v805_v14  ;;  %705 = vmatprep.subr.msk.mxu1 %vm70_vm13, %v805_v14 }
  0x3c   :  { %631 = vmatpush3.msk.msra.mxu0 %vm70_vm13, %v805_v14  ;;  %721 = vmatpush3.msk.msra.mxu1 %vm70_vm13, %v805_v14 }
  0x3d   :  { %632 = vmatprep.subr.msk.mxu0 %vm69_vm14, %v805_v14  ;;  %706 = vmatprep.subr.msk.mxu1 %vm69_vm14, %v805_v14 }
  0x3e   :  { %633 = vmatpush3.msk.msra.mxu0 %vm69_vm14, %v805_v14  ;;  %722 = vmatpush3.msk.msra.mxu1 %vm69_vm14, %v805_v14 }
  0x3f   :  { %634 = vmatprep.subr.msk.mxu0 %vm68_vm15, %v805_v14  ;;  %707 = vmatprep.subr.msk.mxu1 %vm68_vm15, %v805_v14 }
  0x40   :  { %635 = vmatpush3.msk.msra.mxu0 %vm68_vm15, %v805_v14  ;;  %723 = vmatpush3.msk.msra.mxu1 %vm68_vm15, %v805_v14 }
  0x41   :  { %636 = vmatprep.subr.msk.mxu0 %vm67_vm0, %v805_v14  ;;  %708 = vmatprep.subr.msk.mxu1 %vm67_vm0, %v805_v14 }
  0x42   :  { %637 = vmatpush3.msk.msra.mxu0 %vm67_vm0, %v805_v14  ;;  %724 = vmatpush3.msk.msra.mxu1 %vm67_vm0, %v805_v14 }
  0x43   :  { %638 = vmatprep.subr.msk.mxu0 %vm66_vm1, %v805_v14  ;;  %709 = vmatprep.subr.msk.mxu1 %vm66_vm1, %v805_v14 }
  0x44   :  { %639 = vmatpush3.msk.msra.mxu0 %vm66_vm1, %v805_v14  ;;  %725 = vmatpush3.msk.msra.mxu1 %vm66_vm1, %v805_v14 }
  0x45   :  { %641 = vmatmul.mubr.f32.vlgmr.msra.gmra.mxu0 %v115_v26  ;;  %668 = vmatmul.mubr.f32.vlgmr.msra.gmra.mxu1 %v133_v27  ;;  %v411_v26 = vrot.slane %v407_v21, %v835_v6 }
  0x46   :  { %643 = vmatprep.mubr.f32.mxu0 %v116_v28  ;;  %670 = vmatprep.mubr.f32.mxu1 %v134_v29  ;;  %v440_v29 = vsel %vm439_vm6, 1, %v806_v19 }
  0x47   :  { %vm983_vm11 = vcmp.eq.s32.totalorder %v411_v26, 1 }
  0x49   :  { %644 = vmatmul.mubr.f32.gmra.mxu0 %v117_v30  ;;  %671 = vmatmul.mubr.f32.gmra.mxu1 %v135_v31  ;;  %v433_v30 = vrot.slane %v429_v23, %v835_v6 }
  0x4a   :  { %646 = vmatprep.mubr.f32.mxu0 %v118_v32  ;;  %673 = vmatprep.mubr.f32.mxu1 %v136_v33  ;;  %v422_v32 = vrot.slane %v418_v24, %v835_v6 }
  0x4b   :  { %vm989_vm12 = vcmp.eq.s32.totalorder %v433_v30, 1 }
  0x4c   :  { %vm996_vm13 = vcmp.eq.s32.totalorder %v422_v32, 1 }
  0x4d   :  { %647 = vmatmul.mubr.f32.gmra.mxu0 %v119_v34  ;;  %674 = vmatmul.mubr.f32.gmra.mxu1 %v137_v35  ;;  %v451_v34 = vsel %vm450_vm7, 1, %v806_v19  ;;  %v444_v35 = vrot.slane %v440_v29, %v835_v6 }
  0x4e   :  { %649 = vmatprep.mubr.f32.mxu0 %v120_v36  ;;  %676 = vmatprep.mubr.f32.mxu1 %v138_v37 }
  0x4f   :  { %vm1004_vm14 = vcmp.eq.s32.totalorder %v444_v35, 1 }
  0x51   :  { %650 = vmatmul.mubr.f32.gmra.mxu0 %v121_v38  ;;  %677 = vmatmul.mubr.f32.gmra.mxu1 %v139_v39 }
  0x52   :  { %652 = vmatprep.mubr.f32.mxu0 %v122_v40  ;;  %679 = vmatprep.mubr.f32.mxu1 %v140_v41 }
  0x55   :  { %653 = vmatmul.mubr.f32.gmra.mxu0 %v123_v42  ;;  %680 = vmatmul.mubr.f32.gmra.mxu1 %v141_v43  ;;  %v455_v42 = vrot.slane %v451_v34, %v835_v6  ;;  %v462_v43 = vsel %vm461_vm8, 1, %v806_v19 }
  0x56   :  { %655 = vmatprep.mubr.f32.mxu0 %v124_v44  ;;  %682 = vmatprep.mubr.f32.mxu1 %v142_v45 }
  0x57   :  { %vm1022_vm15 = vcmp.eq.s32.totalorder %v455_v42, 1 }
  0x59   :  { %656 = vmatmul.mubr.f32.gmra.mxu0 %v125_v46  ;;  %683 = vmatmul.mubr.f32.gmra.mxu1 %v143_v47 }
  0x5a   :  { %658 = vmatprep.mubr.f32.mxu0 %v126_v48  ;;  %685 = vmatprep.mubr.f32.mxu1 %v144_v49  ;;  %v473_v48 = vsel %vm472_vm9, 1, %v806_v19 }
  0x5d   :  { %659 = vmatmul.mubr.f32.gmra.mxu0 %v127_v50  ;;  %686 = vmatmul.mubr.f32.gmra.mxu1 %v145_v51 }
  0x5e   :  { %661 = vmatprep.mubr.f32.mxu0 %v128_v52  ;;  %688 = vmatprep.mubr.f32.mxu1 %v146_v53 }
  0x61   :  { %662 = vmatmul.mubr.f32.gmra.mxu0 %v129_v54  ;;  %689 = vmatmul.mubr.f32.gmra.mxu1 %v147_v55 }
  0x62   :  { %664 = vmatprep.mubr.f32.mxu0 %v130_v56  ;;  %691 = vmatprep.mubr.f32.mxu1 %v148_v57  ;;  %v466_v57 = vrot.slane %v462_v43, %v835_v6 }
  0x64   :  { %vm1060_vm0 = vcmp.eq.s32.totalorder %v466_v57, 1 }
  0x65   :  { %665 = vmatmul.mubr.f32.gmra.mxu0 %v131_v58  ;;  %692 = vmatmul.mubr.f32.gmra.mxu1 %v149_v59 }
 0x105   :  { %v939_v60 = vpop.f32.mrf.mxu0  ;;  %v941_v61 = vpop.f32.mrf.mxu1 }
 0x107   :  { %v943_v62 = vpop.f32.mrf.mxu0  ;;  %v945_v63 = vpop.f32.mrf.mxu1 }
 0x109   :  { %v645_v0 = vpop.f32.mrf.mxu0  ;;  %v947_v1 = vpop.f32.mrf.mxu1 }
 0x10b   :  { %v226_v2 = vpop.f32.mrf.mxu0  ;;  %v949_v3 = vpop.f32.mrf.mxu1 }
 0x10d   :  { %v951_v4 = vpop.f32.mrf.mxu0  ;;  %v953_v5 = vpop.f32.mrf.mxu1 }
 0x10e   :  { %v403_v52 = vsel %vm979_vm10, %v951_v4, %v939_v60  ;;  %v477_v60 = vrot.slane %v473_v48, %v835_v6 }
 0x10f   :  { %v955_v8 = vpop.f32.mrf.mxu0  ;;  %v957_v9 = vpop.f32.mrf.mxu1 }
 0x110   :  { %vm478_vm1 = vcmp.eq.s32.totalorder %v477_v60, 1 }
 0x111   :  { %v651_v11 = vpop.f32.mrf.mxu0  ;;  %v960_v12 = vpop.f32.mrf.mxu1 }
 0x112   :  { %v405_v40 = vsel %vm979_vm10, %v651_v11, %v645_v0 }
 0x113   :  { %v246_v13 = vpop.f32.mrf.mxu0  ;;  %v962_v14 = vpop.f32.mrf.mxu1 }
 0x114   :  { %v404_v49 = vsel %vm979_vm10, %v246_v13, %v226_v2 }
 0x115   :  { %v654_v15 = vpop.f32.mrf.mxu0  ;;  %v964_v16 = vpop.f32.mrf.mxu1 }
 0x116   :  { %v414_v58 = vsel %vm983_vm11, %v654_v15, %v403_v52 }
 0x117   :  { %v256_v17 = vpop.f32.mrf.mxu0  ;;  %v966_v18 = vpop.f32.mrf.mxu1 }
 0x119   :  { %v657_v7 = vpop.f32.mrf.mxu0  ;;  %v968_v22 = vpop.f32.mrf.mxu1 }
 0x11a   :  { %v416_v44 = vsel %vm983_vm11, %v657_v7, %v405_v40 }
 0x11b   :  { %v266_v27 = vpop.f32.mrf.mxu0  ;;  %v972_v28 = vpop.f32.mrf.mxu1 }
 0x11c   :  { %v415_v53 = vsel %vm983_vm11, %v266_v27, %v404_v49 }
 0x11d   :  { %v660_v31 = vpop.f32.mrf.mxu0  ;;  %v976_v33 = vpop.f32.mrf.mxu1 }
 0x11e   :  { %v425_v2 = vsel %vm996_vm13, %v660_v31, %v414_v58 }
 0x11f   :  { %v276_v38 = vpop.f32.mrf.mxu0  ;;  %v366_v39 = vpop.f32.mrf.mxu1 }
 0x121   :  { %v663_v46 = vpop.f32.mrf.mxu0  ;;  %v690_v47 = vpop.f32.mrf.mxu1 }
 0x122   :  { %v427_v50 = vsel %vm996_vm13, %v663_v46, %v416_v44 }
 0x123   :  { %v438_v54 = vsel %vm989_vm12, %v941_v61, %v427_v50  ;;  %v286_v55 = vpop.f32.mrf.mxu0  ;;  %v376_v56 = vpop.f32.mrf.mxu1  ;;  %v402_v61 = vsel %vm979_vm10, %v955_v8, %v943_v62 }
 0x124   :  { %v426_v59 = vsel %vm996_vm13, %v286_v55, %v415_v53  ;;  %v449_v4 = vsel %vm1004_vm14, %v953_v5, %v438_v54  ;;  %v413_v6 = vsel %vm983_vm11, %v256_v17, %v402_v61 }
 0x125   :  { %v437_v10 = vsel %vm989_vm12, %v945_v63, %v426_v59  ;;  %v666_v11 = vpop.f32.mrf.mxu0  ;;  %v693_v13 = vpop.f32.mrf.mxu1  ;;  %v424_v15 = vsel %vm996_vm13, %v276_v38, %v413_v6 }
 0x126   :  { %v448_v62 = vsel %vm1004_vm14, %v957_v9, %v437_v10  ;;  %v436_v8 = vsel %vm989_vm12, %v666_v11, %v425_v2  ;;  %v460_v9 = vsel %vm1022_vm15, %v964_v16, %v449_v4 }
 0x127   :  { %v447_v5 = vsel %vm1004_vm14, %v947_v1, %v436_v8  ;;  %v296_v63 = vpop.f32.mrf.mxu0  ;;  %v459_v19 = vsel %vm1022_vm15, %v966_v18, %v448_v62  ;;  %v386_v21 = vpop.f32.mrf.mxu1  ;;  %v471_v24 = vsel %vm1060_vm0, %v976_v33, %v460_v9 }
 0x128   :  { %v458_v17 = vsel %vm1022_vm15, %v960_v12, %v447_v5  ;;  %v435_v1 = vsel %vm989_vm12, %v296_v63, %v424_v15  ;;  %v470_v16 = vsel %vm1060_vm0, %v366_v39, %v459_v19  ;;  %v482_v29 = vsel %vm478_vm1, %v693_v13, %v471_v24 }
 0x129   :  { %v446_v18 = vsel %vm1004_vm14, %v949_v3, %v435_v1  ;;  %v469_v12 = vsel %vm1060_vm0, %v968_v22, %v458_v17  ;;  %v481_v26 = vsel %vm478_vm1, %v386_v21, %v470_v16  ;;  %v486_v32 = vmul.f32 %v482_v29, %v482_v29 }
 0x12a   :  { %v457_v7 = vsel %vm1022_vm15, %v962_v14, %v446_v18  ;;  %v480_v23 = vsel %vm478_vm1, %v690_v47, %v469_v12  ;;  %v485_v30 = vmul.f32 %v481_v26, %v481_v26 }
 0x12b   :  { %v468_v3 = vsel %vm1060_vm0, %v972_v28, %v457_v7  ;;  %v484_v22 = vmul.f32 %v480_v23, %v480_v23 }
 0x12c   :  { %v479_v25 = vsel %vm478_vm1, %v376_v56, %v468_v3 }
 0x12d   :  { %v483_v27 = vmul.f32 %v479_v25, %v479_v25 }
 0x12f   :  { %v487_v31 = vadd.f32 %v484_v22, %v483_v27 }
 0x131   :  { %v488_v34 = vadd.f32 %v487_v31, %v485_v30 }
 0x133   :  { %v489_v35 = vadd.f32 %v488_v34, %v486_v32 }
 0x135   :  { %v490_v14 = vrot.slane %v489_v35, 4 }
 0x137   :  { %v491_v36 = vadd.f32 %v490_v14, %v489_v35 }
 0x139   :  { %v492_v37 = vrot.slane %v491_v36, 2 }
 0x13b   :  { %v493_v38 = vadd.f32 %v492_v37, %v491_v36 }
 0x13d   :  { %v494_v39 = vrot.slane %v493_v38, 1 }
 0x13f   :  { %v495_v33 = vadd.f32 %v494_v39, %v493_v38 }
 0x141   :  { %v496_v40 = vmax.f32 %v495_v33, 1e-24 }
 0x143   :  { %733 = vrsqrt.f32 %v496_v40 }
 0x150   :  { %v734_v28 = vpop.eup %733 }
 0x151   :  { %v500_v41 = vmul.f32 %v734_v28, %v481_v26  ;;  %v498_v42 = vmul.f32 %v734_v28, %v479_v25  ;;  %v499_v43 = vmul.f32 %v734_v28, %v480_v23  ;;  %v501_v44 = vmul.f32 %v734_v28, %v482_v29 }
 0x153   :  { %504 = vst [vmem:[#allocation7 + $0x10] sm:$0xff] %v500_v41  ;;  %502 = vst [vmem:[#allocation7] sm:$0xff] %v498_v42 }
 0x154   :  { %503 = vst [vmem:[#allocation7 + $0x8] sm:$0xff] %v499_v43  ;;  %505 = vst [vmem:[#allocation7 + $0x18] sm:$0xff] %v501_v44 }
 0x155   :  { %786 = shalt.err (!%p783_p0)
}
 0x156   :  { %517 = dma.vmem_to_hbm [thread:$0]  %s512_s1, 512, %s1091_s2, [#allocation4], %s803_s18, %s803_s18, %s804_s19  }
 0x157   :  { %799 = dma.done.wait [#allocation4], 512  }
 0x158   :  { %800 = vsyncadd [#allocation4], 4294966784 }
 0x159   :  { %521 = vsyncpa [#allocation3], 1 }
 0x15a   :  { %522 = vsyncpa [#allocation6], 1 }
 0x15b   :  { %523 = vsyncpa [#allocation4], 1 }

</bundles_post_ra>
